<compile_context>
chip_gen: v7x
topology: tpu7x:2x2x1
jax: 0.10.0
libtpu: 0.0.40
codegen_flags: <defaults>
</compile_context>

<pallas_src>
import math

import jax
import jax.numpy as jnp
from jax import lax
from jax.experimental import pallas as pl
from jax.experimental.pallas import tpu as pltpu


# ------------------------- generation-aware budgets ------------------------- #

def _vmem_capacity_bytes():
    """Physical VMEM per TensorCore (128 MiB on v5e/v6e, 64 MiB on v7x)."""
    try:
        cap = getattr(pltpu.get_tpu_info(), "vmem_capacity_bytes", None)
        if cap:
            return int(cap)
    except Exception:
        pass
    return 64 * 1024 * 1024            # conservative (v7x-sized) fallback


_VMEM_CAP = _vmem_capacity_bytes()
# Scoped VMEM budget: generous on 128 MiB parts (v5e/v6e), conservative on the
# 64 MiB v7x, always leaving headroom for compiler-internal scratch.
_VMEM_LIMIT = min(96 * 1024 * 1024, max(32 * 1024 * 1024, _VMEM_CAP // 2))
_BIG_VMEM = _VMEM_CAP >= (96 * 1024 * 1024)

# Tile targets.  Bigger tiles on 128 MiB parts cut K/V HBM re-reads and
# per-grid-step overhead; on v7x (64 MiB) stay smaller so the fused-QKV call
# (3 f32 accumulators + double-buffered x/w/out tiles) fits the scoped budget
# and the parallel grid keeps both TensorCores busy.
_LIN_TM = 512 if _BIG_VMEM else 256
_LIN_TN = 512 if _BIG_VMEM else 256
_LIN_TK = 512
_ATT_TQ = 512 if _BIG_VMEM else 256
_ATT_TK = 512


def _pick_tile(dim, target, aligns):
    """Largest tile <= target that divides `dim`, preferring the alignments in
    `aligns` (tried in order).  Falls back to the full dim, which is always a
    legal (single full-extent) block."""
    if dim <= target:
        return dim
    for align in aligns:
        t = (target // align) * align
        while t >= align:
            if dim % t == 0:
                return t
            t -= align
    # TODO(synk): no aligned divisor (prime-ish dim) -> one full-extent block;
    # very large prime-ish dims would need a masked remainder path instead.
    return dim


# ------------------------- fused tiled linear kernel ------------------------ #

def _make_fused_linear_kernel(n_out):
    def kernel(x_ref, *refs):
        w_refs = refs[:n_out]
        b_refs = refs[n_out:2 * n_out]
        o_refs = refs[2 * n_out:3 * n_out]
        acc_refs = refs[3 * n_out:]

        @pl.when(pl.program_id(2) == 0)
        def _init():
            for acc in acc_refs:
                acc[...] = jnp.zeros_like(acc)

        # One load of the X tile, shared by every weight matrix.  Operands stay
        # in the model dtype (bf16 models hit the native MXU path); only the
        # accumulator is f32.
        x = x_ref[...]
        for w, acc in zip(w_refs, acc_refs):
            acc[...] += jnp.dot(x, w[...], preferred_element_type=jnp.float32)

        @pl.when(pl.program_id(2) == pl.num_programs(2) - 1)
        def _finalize():
            for b, o, acc in zip(b_refs, o_refs, acc_refs):
                o[...] = (acc[...] + b[...].astype(jnp.float32)).astype(o.dtype)

    return kernel


def fused_linear(x, weights, biases, *, tm=None, tn=None, tk=None):
    """Computes [x @ w_i + b_i for i] in one tiled, pipelined pallas_call.

    All weights must share the same (K, N) shape (e.g. the Q/K/V projections),
    so the X tile is read from HBM once per grid step and reused n_out times."""
    M, K = x.shape
    N = weights[0].shape[1]
    n = len(weights)
    assert all(w.shape == (K, N) for w in weights)

    tm_ = _pick_tile(M, tm or _LIN_TM, (8,))
    tn_ = _pick_tile(N, tn or _LIN_TN, (256, 128))
    tk_ = _pick_tile(K, tk or _LIN_TK, (256, 128))
    grid = (M // tm_, N // tn_, K // tk_)

    x_map = lambda i, j, k: (i, k)
    w_map = lambda i, j, k: (k, j)
    b_map = lambda i, j, k: (0, j)
    o_map = lambda i, j, k: (i, j)

    in_specs = [pl.BlockSpec((tm_, tk_), x_map)]
    in_specs += [pl.BlockSpec((tk_, tn_), w_map) for _ in range(n)]
    in_specs += [pl.BlockSpec((1, tn_), b_map) for _ in range(n)]

    return pl.pallas_call(
        _make_fused_linear_kernel(n),
        out_shape=tuple(jax.ShapeDtypeStruct((M, N), x.dtype) for _ in range(n)),
        grid=grid,
        in_specs=in_specs,
        out_specs=tuple(pl.BlockSpec((tm_, tn_), o_map) for _ in range(n)),
        scratch_shapes=[pltpu.VMEM((tm_, tn_), jnp.float32) for _ in range(n)],
        compiler_params=pltpu.CompilerParams(
            dimension_semantics=("parallel", "parallel", "arbitrary"),
            vmem_limit_bytes=_VMEM_LIMIT,
        ),
    )(x, *weights, *[b.reshape(1, N) for b in biases])


# ------------------------ flash-style attention kernel ---------------------- #

def _make_attention_kernel(n_heads, head_dim, scale):
    def split_heads(x):
        # (t, H*D) -> (H, t, D): static lane slices + a leading-axis stack.
        # Done once per tile (q: once per q tile, k/v: once per kv step)
        # instead of once per head per kv step in the old head loop.
        return jnp.stack(
            [x[:, h * head_dim:(h + 1) * head_dim] for h in range(n_heads)],
            axis=0)

    def kernel(q_ref, k_ref, v_ref, o_ref, q_sc, m_sc, l_sc, acc_sc):
        kv_i = pl.program_id(2)

        @pl.when(kv_i == 0)
        def _init():
            # q-side work (load, f32 cast, softmax-scale fold, head split) is
            # invariant along the kv grid axis -> hoist out of the kv loop.
            # Attention math is f32, mirroring autocast(enabled=False)+.float();
            # the projections already fed the MXU in the model dtype.
            q = q_ref[...].astype(jnp.float32) * scale          # (tq, H*D)
            q_sc[...] = split_heads(q)                          # (H, tq, D)
            m_sc[...] = jnp.full_like(m_sc, -jnp.inf)
            l_sc[...] = jnp.zeros_like(l_sc)
            acc_sc[...] = jnp.zeros_like(acc_sc)

        kh = split_heads(k_ref[...].astype(jnp.float32))        # (H, tk, D)
        vh = split_heads(v_ref[...].astype(jnp.float32))        # (H, tk, D)
        qh = q_sc[...]                                          # (H, tq, D)

        # Batched-over-heads QK^T (contracts head_dim directly; no k.T).
        s = jnp.einsum("hqd,hkd->hqk", qh, kh,
                       preferred_element_type=jnp.float32)      # (H, tq, tk)

        m_prev = m_sc[...]                                      # (H, tq, 1)
        m_new = jnp.maximum(m_prev, jnp.max(s, axis=-1, keepdims=True))
        alpha = jnp.exp(m_prev - m_new)
        p = jnp.exp(s - m_new)                                  # (H, tq, tk)
        l_sc[...] = alpha * l_sc[...] + jnp.sum(p, axis=-1, keepdims=True)
        acc_sc[...] = alpha * acc_sc[...] + jnp.einsum(
            "hqk,hkd->hqd", p, vh, preferred_element_type=jnp.float32)
        m_sc[...] = m_new

        @pl.when(kv_i == pl.num_programs(2) - 1)
        def _finalize():
            # Exact reciprocal keeps 1e-5 agreement with the f32 reference;
            # approx=True would move the divide to the otherwise-idle EUP slot
            # when the accuracy budget allows it.
            inv = pl.reciprocal(l_sc[...], approx=False)        # (H, tq, 1)
            out = acc_sc[...] * inv                             # (H, tq, D)
            # One lane-dense (tq, H*D) store (unmasked vst) instead of H
            # masked per-head partial stores.
            o_ref[...] = jnp.concatenate(
                [out[h] for h in range(n_heads)], axis=-1).astype(o_ref.dtype)

    return kernel


def attention(q, k, v, *, n_heads, head_dim, tq=None, tk=None):
    """Flash-style multi-head attention over (B, S, H*D) tensors (mask=None)."""
    B, Sq, HD = q.shape
    Sk = k.shape[1]
    assert HD == n_heads * head_dim
    scale = 1.0 / math.sqrt(head_dim)

    tq_ = _pick_tile(Sq, tq or _ATT_TQ, (8,))
    # Prefer 256-aligned kv tiles so the PV matmul keeps the 256-deep MXU full.
    tk_ = _pick_tile(Sk, tk or _ATT_TK, (256, 8))
    grid = (B, Sq // tq_, Sk // tk_)

    q_map = lambda b, qi, ki: (b, qi, 0)
    kv_map = lambda b, qi, ki: (b, ki, 0)

    return pl.pallas_call(
        _make_attention_kernel(n_heads, head_dim, scale),
        out_shape=jax.ShapeDtypeStruct((B, Sq, HD), q.dtype),
        grid=grid,
        in_specs=[
            pl.BlockSpec((None, tq_, HD), q_map),
            pl.BlockSpec((None, tk_, HD), kv_map),
            pl.BlockSpec((None, tk_, HD), kv_map),
        ],
        out_specs=pl.BlockSpec((None, tq_, HD), q_map),
        scratch_shapes=[
            pltpu.VMEM((n_heads, tq_, head_dim), jnp.float32),   # scaled split q
            pltpu.VMEM((n_heads, tq_, 1), jnp.float32),          # running max
            pltpu.VMEM((n_heads, tq_, 1), jnp.float32),          # running denom
            pltpu.VMEM((n_heads, tq_, head_dim), jnp.float32),   # running output
        ],
        compiler_params=pltpu.CompilerParams(
            dimension_semantics=("parallel", "parallel", "arbitrary"),
            vmem_limit_bytes=_VMEM_LIMIT,
        ),
    )(q, k, v)


# ------------------------------- Module glue -------------------------------- #

def init_params(key, emb_dim, kv_emb_dim, n_heads, head_dim, dtype=jnp.float32):
    hid = n_heads * head_dim
    ks = jax.random.split(key, 8)

    def lin(kw, kb, fan_in, fan_out):
        bound = 1.0 / math.sqrt(fan_in)
        w = jax.random.uniform(kw, (fan_in, fan_out), dtype, -bound, bound)
        b = jax.random.uniform(kb, (fan_out,), dtype, -bound, bound)
        return w, b

    wq, bq = lin(ks[0], ks[1], emb_dim, hid)
    wk, bk = lin(ks[2], ks[3], kv_emb_dim, hid)
    wv, bv = lin(ks[4], ks[5], kv_emb_dim, hid)
    wo, bo = lin(ks[6], ks[7], hid, hid)
    return dict(wq=wq, bq=bq, wk=wk, bk=bk, wv=wv, bv=bv, wo=wo, bo=bo)


def multi_head_attention(X, params, n_heads, head_dim, enc_ebs=None):
    """Forward pass equivalent to MultiHeadAttention.forward (mask=None)."""
    # TODO(synk): the `mask` argument of the PyTorch forward is not supported
    # (mask=None path only).
    B, Sq, E = X.shape
    hid = n_heads * head_dim
    x2d = X.reshape(B * Sq, E)

    if enc_ebs is None:
        # Fused QKV projection: X read from HBM once, one kernel launch.
        q2d, k2d, v2d = fused_linear(
            x2d,
            (params["wq"], params["wk"], params["wv"]),
            (params["bq"], params["bk"], params["bv"]))
        Sk = Sq
    else:
        _, Sk, Ek = enc_ebs.shape
        kv2d = enc_ebs.reshape(B * Sk, Ek)
        (q2d,) = fused_linear(x2d, (params["wq"],), (params["bq"],))
        k2d, v2d = fused_linear(
            kv2d, (params["wk"], params["wv"]), (params["bk"], params["bv"]))

    # Free reshapes only (no HBM transposes); heads stay packed along the last
    # dim and are split head-major inside the attention kernel's VMEM.
    q = q2d.reshape(B, Sq, hid)
    k = k2d.reshape(B, Sk, hid)
    v = v2d.reshape(B, Sk, hid)

    att = attention(q, k, v, n_heads=n_heads, head_dim=head_dim)   # (B, Sq, hid)

    (out2d,) = fused_linear(att.reshape(B * Sq, hid),
                            (params["wo"],), (params["bo"],))
    return out2d.reshape(B, Sq, hid)


# -------------------------------- References --------------------------------- #

_HI = lax.Precision.HIGHEST


def reference(X, params, n_heads, head_dim, enc_ebs=None):
    B, Sq, E = X.shape
    hid = n_heads * head_dim
    kv_src = X if enc_ebs is None else enc_ebs
    Sk = kv_src.shape[1]
    q = jnp.dot(X.reshape(B * Sq, E), params["wq"], precision=_HI) + params["bq"]
    k = jnp.dot(kv_src.reshape(B * Sk, -1), params["wk"], precision=_HI) + params["bk"]
    v = jnp.dot(kv_src.reshape(B * Sk, -1), params["wv"], precision=_HI) + params["bv"]
    q = q.reshape(B, Sq, n_heads, head_dim).transpose(0, 2, 1, 3)
    k = k.reshape(B, Sk, n_heads, head_dim).transpose(0, 2, 1, 3)
    v = v.reshape(B, Sk, n_heads, head_dim).transpose(0, 2, 1, 3)
    s = jnp.einsum("bhqd,bhkd->bhqk", q, k,
                   precision=_HI).astype(jnp.float32) / math.sqrt(head_dim)
    att = jax.nn.softmax(s, axis=-1)
    o = jnp.einsum("bhqk,bhkd->bhqd", att, v.astype(jnp.float32),
                   precision=_HI).astype(X.dtype)
    o = o.transpose(0, 2, 1, 3).reshape(B * Sq, hid)
    return (jnp.dot(o, params["wo"], precision=_HI) + params["bo"]).reshape(B, Sq, hid)


def attn_reference(q, k, v, n_heads, head_dim):
    B, Sq, HD = q.shape
    Sk = k.shape[1]
    qh = q.reshape(B, Sq, n_heads, head_dim).transpose(0, 2, 1, 3)
    kh = k.reshape(B, Sk, n_heads, head_dim).transpose(0, 2, 1, 3)
    vh = v.reshape(B, Sk, n_heads, head_dim).transpose(0, 2, 1, 3)
    s = jnp.einsum("bhqd,bhkd->bhqk", qh, kh, precision=_HI) / math.sqrt(head_dim)
    a = jax.nn.softmax(s, axis=-1)
    o = jnp.einsum("bhqk,bhkd->bhqd", a, vh, precision=_HI)
    return o.transpose(0, 2, 1, 3).reshape(B, Sq, HD)


# ---------------------------------- Main ------------------------------------ #

if __name__ == "__main__":
    # Config: n_heads=4, head_dim=8 -> hid_dim=32; emb_dim=32.
    n_heads, head_dim = 4, 8
    B, S, emb_dim = 2, 8, 32

    key = jax.random.PRNGKey(0)
    kp, kx, kp2, ke, kt = jax.random.split(key, 5)

    # --- self-attention ---
    params = init_params(kp, emb_dim, emb_dim, n_heads, head_dim)
    X = jax.random.normal(kx, (B, S, emb_dim), dtype=jnp.float32)

    out = jax.block_until_ready(multi_head_attention(X, params, n_heads, head_dim))
    ref = reference(X, params, n_heads, head_dim)
    assert out.shape == (B, S, n_heads * head_dim)
    assert jnp.allclose(out, ref, atol=1e-5, rtol=1e-5), "self-attention mismatch"

    # --- cross-attention (enc_ebs with different kv_emb_dim and kv length) ---
    kv_emb_dim, Se = 48, 16
    params_x = init_params(kp2, emb_dim, kv_emb_dim, n_heads, head_dim)
    enc = jax.random.normal(ke, (B, Se, kv_emb_dim), dtype=jnp.float32)

    out_x = jax.block_until_ready(
        multi_head_attention(X, params_x, n_heads, head_dim, enc_ebs=enc))
    ref_x = reference(X, params_x, n_heads, head_dim, enc_ebs=enc)
    assert jnp.allclose(out_x, ref_x, atol=1e-5, rtol=1e-5), "cross-attention mismatch"

    # --- multi-step-grid checks: exercise the K-accumulation of the linear
    #     kernel and the online-softmax accumulation of the attention kernel
    #     with explicit small tiles ---
    k1, k2, k3, k4, k5 = jax.random.split(kt, 5)

    M, Kd, Nd = 512, 256, 128
    xa = jax.random.normal(k1, (M, Kd), dtype=jnp.float32)
    wa = jax.random.normal(k2, (Kd, Nd), dtype=jnp.float32) / math.sqrt(Kd)
    ba = jax.random.normal(k3, (Nd,), dtype=jnp.float32)
    (ya,) = fused_linear(xa, (wa,), (ba,), tm=128, tn=128, tk=128)
    ya = jax.block_until_ready(ya)
    ya_ref = jnp.dot(xa, wa, precision=_HI) + ba
    assert jnp.allclose(ya, ya_ref, atol=2e-5, rtol=2e-5), "tiled linear mismatch"

    H2, D2, Sq2 = 4, 32, 256
    HD2 = H2 * D2
    q2 = jax.random.normal(k4, (B, Sq2, HD2), dtype=jnp.float32)
    kv2 = jax.random.normal(k5, (2, B, Sq2, HD2), dtype=jnp.float32)
    o2 = jax.block_until_ready(
        attention(q2, kv2[0], kv2[1], n_heads=H2, head_dim=D2, tq=128, tk=128))
    o2_ref = attn_reference(q2, kv2[0], kv2[1], H2, D2)
    assert jnp.allclose(o2, o2_ref, atol=2e-5, rtol=2e-5), "tiled attention mismatch"

    print("KERNEL_OK")
</pallas_src>

<mosaic_0001>
module attributes {stable_mosaic.version = 11 : i64} {
  func.func @kernel(%arg0: i32, %arg1: i32, %arg2: i32, %arg3: memref<16x32xf32, #tpu.memory_space<vmem>>, %arg4: memref<32x32xf32, #tpu.memory_space<vmem>>, %arg5: memref<32x32xf32, #tpu.memory_space<vmem>>, %arg6: memref<32x32xf32, #tpu.memory_space<vmem>>, %arg7: memref<1x32xf32, #tpu.memory_space<vmem>>, %arg8: memref<1x32xf32, #tpu.memory_space<vmem>>, %arg9: memref<1x32xf32, #tpu.memory_space<vmem>>, %arg10: memref<16x32xf32, #tpu.memory_space<vmem>>, %arg11: memref<16x32xf32, #tpu.memory_space<vmem>>, %arg12: memref<16x32xf32, #tpu.memory_space<vmem>>, %arg13: memref<16x32xf32, #tpu.memory_space<vmem>>, %arg14: memref<16x32xf32, #tpu.memory_space<vmem>>, %arg15: memref<16x32xf32, #tpu.memory_space<vmem>>) attributes {dimension_semantics = [#tpu.dimension_semantics<parallel>, #tpu.dimension_semantics<parallel>, #tpu.dimension_semantics<arbitrary>], iteration_bounds = array<i64: 1, 1, 1>, scalar_prefetch = 0 : i64, scratch_operands = 3 : i64, tpu.core_type = #tpu.core_type<tc>, window_params = [{transform_indices = @transform_0, window_bounds = array<i64: 16, 32>}, {transform_indices = @transform_1, window_bounds = array<i64: 32, 32>}, {transform_indices = @transform_2, window_bounds = array<i64: 32, 32>}, {transform_indices = @transform_3, window_bounds = array<i64: 32, 32>}, {transform_indices = @transform_4, window_bounds = array<i64: 1, 32>}, {transform_indices = @transform_5, window_bounds = array<i64: 1, 32>}, {transform_indices = @transform_6, window_bounds = array<i64: 1, 32>}, {transform_indices = @transform_7, window_bounds = array<i64: 16, 32>}, {transform_indices = @transform_8, window_bounds = array<i64: 16, 32>}, {transform_indices = @transform_9, window_bounds = array<i64: 16, 32>}]} {
    %c0_i32 = arith.constant 0 : i32
    %0 = arith.cmpi eq, %arg2, %c0_i32 : i32
    %1 = arith.extui %0 : i1 to i32
    %c0_i32_0 = arith.constant 0 : i32
    %2 = arith.cmpi ne, %1, %c0_i32_0 : i32
    scf.if %2 {
      %cst_24 = arith.constant 0.000000e+00 : f32
      %22 = vector.broadcast %cst_24 : f32 to vector<16x32xf32>
      %c0_25 = arith.constant 0 : index
      %c0_26 = arith.constant 0 : index
      %23 = vector.load %arg13[%c0_25, %c0_26] : memref<16x32xf32, #tpu.memory_space<vmem>>, vector<16x32xf32>
      tpu.vector_store %arg13[%c0_25, %c0_26], %22 {strides = array<i32>} : memref<16x32xf32, #tpu.memory_space<vmem>>, vector<16x32xf32>,
      %cst_27 = arith.constant 0.000000e+00 : f32
      %24 = vector.broadcast %cst_27 : f32 to vector<16x32xf32>
      %c0_28 = arith.constant 0 : index
      %c0_29 = arith.constant 0 : index
      %25 = vector.load %arg14[%c0_28, %c0_29] : memref<16x32xf32, #tpu.memory_space<vmem>>, vector<16x32xf32>
      tpu.vector_store %arg14[%c0_28, %c0_29], %24 {strides = array<i32>} : memref<16x32xf32, #tpu.memory_space<vmem>>, vector<16x32xf32>,
      %cst_30 = arith.constant 0.000000e+00 : f32
      %26 = vector.broadcast %cst_30 : f32 to vector<16x32xf32>
      %c0_31 = arith.constant 0 : index
      %c0_32 = arith.constant 0 : index
      %27 = vector.load %arg15[%c0_31, %c0_32] : memref<16x32xf32, #tpu.memory_space<vmem>>, vector<16x32xf32>
      tpu.vector_store %arg15[%c0_31, %c0_32], %26 {strides = array<i32>} : memref<16x32xf32, #tpu.memory_space<vmem>>, vector<16x32xf32>,
    } else {
    }
    %c0 = arith.constant 0 : index
    %c0_1 = arith.constant 0 : index
    %3 = vector.load %arg3[%c0, %c0_1] : memref<16x32xf32, #tpu.memory_space<vmem>>, vector<16x32xf32>
    %c0_2 = arith.constant 0 : index
    %c0_3 = arith.constant 0 : index
    %4 = vector.load %arg13[%c0_2, %c0_3] : memref<16x32xf32, #tpu.memory_space<vmem>>, vector<16x32xf32>
    %c0_4 = arith.constant 0 : index
    %c0_5 = arith.constant 0 : index
    %5 = vector.load %arg4[%c0_4, %c0_5] : memref<32x32xf32, #tpu.memory_space<vmem>>, vector<32x32xf32>
    %cst = arith.constant dense<0.000000e+00> : vector<16x32xf32>
    %6 = tpu.matmul %3, %5, %cst {dimension_numbers = #tpu.dot_dimension_numbers<[1], [0], [0], [1], [0, 0, 1, 1], [], []>} : vector<16x32xf32>, vector<32x32xf32>, vector<16x32xf32> -> vector<16x32xf32>
    %7 = arith.addf %4, %6 : vector<16x32xf32>
    %c0_6 = arith.constant 0 : index
    %c0_7 = arith.constant 0 : index
    %8 = vector.load %arg13[%c0_6, %c0_7] : memref<16x32xf32, #tpu.memory_space<vmem>>, vector<16x32xf32>
    tpu.vector_store %arg13[%c0_6, %c0_7], %7 {strides = array<i32>} : memref<16x32xf32, #tpu.memory_space<vmem>>, vector<16x32xf32>,
    %c0_8 = arith.constant 0 : index
    %c0_9 = arith.constant 0 : index
    %9 = vector.load %arg14[%c0_8, %c0_9] : memref<16x32xf32, #tpu.memory_space<vmem>>, vector<16x32xf32>
    %c0_10 = arith.constant 0 : index
    %c0_11 = arith.constant 0 : index
    %10 = vector.load %arg5[%c0_10, %c0_11] : memref<32x32xf32, #tpu.memory_space<vmem>>, vector<32x32xf32>
    %cst_12 = arith.constant dense<0.000000e+00> : vector<16x32xf32>
    %11 = tpu.matmul %3, %10, %cst_12 {dimension_numbers = #tpu.dot_dimension_numbers<[1], [0], [0], [1], [0, 0, 1, 1], [], []>} : vector<16x32xf32>, vector<32x32xf32>, vector<16x32xf32> -> vector<16x32xf32>
    %12 = arith.addf %9, %11 : vector<16x32xf32>
    %c0_13 = arith.constant 0 : index
    %c0_14 = arith.constant 0 : index
    %13 = vector.load %arg14[%c0_13, %c0_14] : memref<16x32xf32, #tpu.memory_space<vmem>>, vector<16x32xf32>
    tpu.vector_store %arg14[%c0_13, %c0_14], %12 {strides = array<i32>} : memref<16x32xf32, #tpu.memory_space<vmem>>, vector<16x32xf32>,
    %c0_15 = arith.constant 0 : index
    %c0_16 = arith.constant 0 : index
    %14 = vector.load %arg15[%c0_15, %c0_16] : memref<16x32xf32, #tpu.memory_space<vmem>>, vector<16x32xf32>
    %c0_17 = arith.constant 0 : index
    %c0_18 = arith.constant 0 : index
    %15 = vector.load %arg6[%c0_17, %c0_18] : memref<32x32xf32, #tpu.memory_space<vmem>>, vector<32x32xf32>
    %cst_19 = arith.constant dense<0.000000e+00> : vector<16x32xf32>
    %16 = tpu.matmul %3, %15, %cst_19 {dimension_numbers = #tpu.dot_dimension_numbers<[1], [0], [0], [1], [0, 0, 1, 1], [], []>} : vector<16x32xf32>, vector<32x32xf32>, vector<16x32xf32> -> vector<16x32xf32>
    %17 = arith.addf %14, %16 : vector<16x32xf32>
    %c0_20 = arith.constant 0 : index
    %c0_21 = arith.constant 0 : index
    %18 = vector.load %arg15[%c0_20, %c0_21] : memref<16x32xf32, #tpu.memory_space<vmem>>, vector<16x32xf32>
    tpu.vector_store %arg15[%c0_20, %c0_21], %17 {strides = array<i32>} : memref<16x32xf32, #tpu.memory_space<vmem>>, vector<16x32xf32>,
    %c0_i32_22 = arith.constant 0 : i32
    %19 = arith.cmpi eq, %arg2, %c0_i32_22 : i32
    %20 = arith.extui %19 : i1 to i32
    %c0_i32_23 = arith.constant 0 : i32
    %21 = arith.cmpi ne, %20, %c0_i32_23 : i32
    scf.if %21 {
      %c0_24 = arith.constant 0 : index
      %c0_25 = arith.constant 0 : index
      %22 = vector.load %arg13[%c0_24, %c0_25] : memref<16x32xf32, #tpu.memory_space<vmem>>, vector<16x32xf32>
      %c0_26 = arith.constant 0 : index
      %c0_27 = arith.constant 0 : index
      %23 = vector.load %arg7[%c0_26, %c0_27] : memref<1x32xf32, #tpu.memory_space<vmem>>, vector<1x32xf32>
      %24 = vector.broadcast %23 : vector<1x32xf32> to vector<16x32xf32>
      %25 = arith.addf %22, %24 : vector<16x32xf32>
      %c0_28 = arith.constant 0 : index
      %c0_29 = arith.constant 0 : index
      %26 = vector.load %arg10[%c0_28, %c0_29] : memref<16x32xf32, #tpu.memory_space<vmem>>, vector<16x32xf32>
      tpu.vector_store %arg10[%c0_28, %c0_29], %25 {strides = array<i32>} : memref<16x32xf32, #tpu.memory_space<vmem>>, vector<16x32xf32>,
      %c0_30 = arith.constant 0 : index
      %c0_31 = arith.constant 0 : index
      %27 = vector.load %arg14[%c0_30, %c0_31] : memref<16x32xf32, #tpu.memory_space<vmem>>, vector<16x32xf32>
      %c0_32 = arith.constant 0 : index
      %c0_33 = arith.constant 0 : index
      %28 = vector.load %arg8[%c0_32, %c0_33] : memref<1x32xf32, #tpu.memory_space<vmem>>, vector<1x32xf32>
      %29 = vector.broadcast %28 : vector<1x32xf32> to vector<16x32xf32>
      %30 = arith.addf %27, %29 : vector<16x32xf32>
      %c0_34 = arith.constant 0 : index
      %c0_35 = arith.constant 0 : index
      %31 = vector.load %arg11[%c0_34, %c0_35] : memref<16x32xf32, #tpu.memory_space<vmem>>, vector<16x32xf32>
      tpu.vector_store %arg11[%c0_34, %c0_35], %30 {strides = array<i32>} : memref<16x32xf32, #tpu.memory_space<vmem>>, vector<16x32xf32>,
      %c0_36 = arith.constant 0 : index
      %c0_37 = arith.constant 0 : index
      %32 = vector.load %arg15[%c0_36, %c0_37] : memref<16x32xf32, #tpu.memory_space<vmem>>, vector<16x32xf32>
      %c0_38 = arith.constant 0 : index
      %c0_39 = arith.constant 0 : index
      %33 = vector.load %arg9[%c0_38, %c0_39] : memref<1x32xf32, #tpu.memory_space<vmem>>, vector<1x32xf32>
      %34 = vector.broadcast %33 : vector<1x32xf32> to vector<16x32xf32>
      %35 = arith.addf %32, %34 : vector<16x32xf32>
      %c0_40 = arith.constant 0 : index
      %c0_41 = arith.constant 0 : index
      %36 = vector.load %arg12[%c0_40, %c0_41] : memref<16x32xf32, #tpu.memory_space<vmem>>, vector<16x32xf32>
      tpu.vector_store %arg12[%c0_40, %c0_41], %35 {strides = array<i32>} : memref<16x32xf32, #tpu.memory_space<vmem>>, vector<16x32xf32>,
    } else {
    }
    return
  }
  func.func @transform_0(%arg0: i32, %arg1: i32, %arg2: i32) -> (i32, i32) {
    %c0_i32 = arith.constant 0 : i32
    return %arg0, %arg2 : i32, i32
  }
  func.func @transform_1(%arg0: i32, %arg1: i32, %arg2: i32) -> (i32, i32) {
    %c0_i32 = arith.constant 0 : i32
    return %arg2, %arg1 : i32, i32
  }
  func.func @transform_2(%arg0: i32, %arg1: i32, %arg2: i32) -> (i32, i32) {
    %c0_i32 = arith.constant 0 : i32
    return %arg2, %arg1 : i32, i32
  }
  func.func @transform_3(%arg0: i32, %arg1: i32, %arg2: i32) -> (i32, i32) {
    %c0_i32 = arith.constant 0 : i32
    return %arg2, %arg1 : i32, i32
  }
  func.func @transform_4(%arg0: i32, %arg1: i32, %arg2: i32) -> (i32, i32) {
    %c0_i32 = arith.constant 0 : i32
    %c0_i32_0 = arith.constant 0 : i32
    return %c0_i32, %arg1 : i32, i32
  }
  func.func @transform_5(%arg0: i32, %arg1: i32, %arg2: i32) -> (i32, i32) {
    %c0_i32 = arith.constant 0 : i32
    %c0_i32_0 = arith.constant 0 : i32
    return %c0_i32, %arg1 : i32, i32
  }
  func.func @transform_6(%arg0: i32, %arg1: i32, %arg2: i32) -> (i32, i32) {
    %c0_i32 = arith.constant 0 : i32
    %c0_i32_0 = arith.constant 0 : i32
    return %c0_i32, %arg1 : i32, i32
  }
  func.func @transform_7(%arg0: i32, %arg1: i32, %arg2: i32) -> (i32, i32) {
    %c0_i32 = arith.constant 0 : i32
    return %arg0, %arg1 : i32, i32
  }
  func.func @transform_8(%arg0: i32, %arg1: i32, %arg2: i32) -> (i32, i32) {
    %c0_i32 = arith.constant 0 : i32
    return %arg0, %arg1 : i32, i32
  }
  func.func @transform_9(%arg0: i32, %arg1: i32, %arg2: i32) -> (i32, i32) {
    %c0_i32 = arith.constant 0 : i32
    return %arg0, %arg1 : i32, i32
  }
}

</mosaic_0001>

<bundles_post_ra>
// kernel: tpu_custom_call.1
= control target key start
LH: loop header
LB: loop body
LE: loop exit
PB: predicated region body
PF: predicated region fallthrough
CT: control target
= control target key end

     0   :  { %15 = vsyncpa [#allocation6], 0  ;;  %s930_s0 = inlined_call_operand.hbm [shape: f32[16,32], index: 0, kind: input, shape index: {}]   ;;  %s931_s1 = inlined_call_operand.hbm [shape: f32[32,32], index: 1, kind: input, shape index: {}]   ;;  %s932_s2 = inlined_call_operand.hbm [shape: f32[32,32], index: 2, kind: input, shape index: {}]   ;;  %s933_s3 = inlined_call_operand.hbm [shape: f32[32,32], index: 3, kind: input, shape index: {}]   ;;  %s934_s4 = inlined_call_operand.vmem [shape: f32[1,32], index: 4, kind: input, shape index: {}]   ;;  %s935_s5 = inlined_call_operand.vmem [shape: f32[1,32], index: 5, kind: input, shape index: {}]   ;;  %s936_s6 = inlined_call_operand.vmem [shape: f32[1,32], index: 6, kind: input, shape index: {}]   ;;  %s937_s7 = inlined_call_operand.hbm [shape: f32[16,32], index: 7, kind: output, shape index: {0}]   ;;  %s938_s8 = inlined_call_operand.hbm [shape: f32[16,32], index: 8, kind: output, shape index: {1}]   ;;  %s939_s9 = inlined_call_operand.hbm [shape: f32[16,32], index: 9, kind: output, shape index: {2}]  }
   0x1   :  { %16 = vsyncpa [#allocation9], 0 }
   0x2   :  { %17 = vsyncpa [#allocation12], 0 }
   0x3   :  { %18 = vsyncpa [#allocation7], 0 }
   0x4   :  { %19 = vsyncpa [#allocation15], 0  ;;  %s711_s30 = smov [#allocation8]   ;;  %s712_s11 = smov [#allocation5]  }
   0x5   :  { %s37_s10 = sshll.u32 %s711_s30, 4  ;;  %s25_s12 = sshll.u32 %s712_s11, 4  ;;  %s38_s10 = int_to_ptr.vmem [resolvable:$true] %s37_s10  ;;  %s771_s12 = int_to_ptr.vmem [resolvable:$true] %s25_s12 }
   0x6   :  { %s547_s15 = scalar_lea.hbm %s931_s1, 512 }
   0x7   :  { %p548_p0 = scmp.ne.s32.totalorder %s931_s1, %s547_s15  ;;  %p551_p1 = scmp.lt.u32.totalorder %s547_s15, %s931_s1 }
   0x9   :  { %p553_p2 = pnand %p551_p1, %p548_p0 }
   0xb   :  { %556 = shalt.err (!%p553_p2)
}
   0xc   :  { %s557_s20 = scalar_lea.vmem %s38_s10, 512  ;;  %p562_p4 = scmp.lt.s32.totalorder %s38_s10, %s38_s10 }
   0xd   :  { %p558_p3 = scmp.ne.s32.totalorder %s38_s10, %s557_s20  ;;  %p563_p5 = scmp.lt.s32.totalorder %s557_s20, %s557_s20 }
   0xf   :  { %p564_p6 = por %p563_p5, %p562_p4 }
  0x11   :  { %p565_p7 = pnand %p564_p6, %p558_p3 }
  0x13   :  { %568 = shalt.err (!%p565_p7)
}
  0x14   :  { %s713_s21 = smov 128   ;;  %s714_s22 = smov 8  }
  0x15   :  { %43 = dma.hbm_to_vmem [thread:$0]  %s931_s1, 512, %s38_s10, [#allocation9], %s713_s21, %s713_s21, %s714_s22  }
  0x16   :  { %s569_s27 = scalar_lea.hbm %s930_s0, 256 }
  0x17   :  { %p570_p8 = scmp.ne.s32.totalorder %s930_s0, %s569_s27  ;;  %p573_p9 = scmp.lt.u32.totalorder %s569_s27, %s930_s0 }
  0x19   :  { %p575_p10 = pnand %p573_p9, %p570_p8 }
  0x1b   :  { %578 = shalt.err (!%p575_p10)
}
  0x1c   :  { %s579_s13 = scalar_lea.vmem %s771_s12, 256  ;;  %p584_p12 = scmp.lt.s32.totalorder %s771_s12, %s771_s12 }
  0x1d   :  { %p580_p11 = scmp.ne.s32.totalorder %s771_s12, %s579_s13  ;;  %p585_p13 = scmp.lt.s32.totalorder %s579_s13, %s579_s13 }
  0x1f   :  { %p586_p0 = por %p585_p13, %p584_p12 }
  0x21   :  { %p587_p1 = pnand %p586_p0, %p580_p11 }
  0x23   :  { %590 = shalt.err (!%p587_p1)
}
  0x24   :  { %31 = dma.hbm_to_vmem [thread:$0]  %s930_s0, 256, %s771_s12, [#allocation6], %s713_s21, %s713_s21, %s714_s22  }
  0x25   :  { %s715_s14 = smov [#allocation10]   ;;  %s716_s16 = smov [#allocation11]  }
  0x26   :  { %s49_s15 = sshll.u32 %s715_s14, 4  ;;  %s61_s17 = sshll.u32 %s716_s16, 4  ;;  %s50_s15 = int_to_ptr.vmem [resolvable:$true] %s49_s15  ;;  %s808_s17 = int_to_ptr.vmem [resolvable:$true] %s61_s17 }
  0x27   :  { %s591_s20 = scalar_lea.hbm %s932_s2, 512 }
  0x28   :  { %p592_p2 = scmp.ne.s32.totalorder %s932_s2, %s591_s20  ;;  %p595_p3 = scmp.lt.u32.totalorder %s591_s20, %s932_s2 }
  0x2a   :  { %p597_p4 = pnand %p595_p3, %p592_p2 }
  0x2c   :  { %600 = shalt.err (!%p597_p4)
}
  0x2d   :  { %s601_s0 = scalar_lea.vmem %s50_s15, 512  ;;  %p606_p6 = scmp.lt.s32.totalorder %s50_s15, %s50_s15 }
  0x2e   :  { %p602_p5 = scmp.ne.s32.totalorder %s50_s15, %s601_s0  ;;  %p607_p7 = scmp.lt.s32.totalorder %s601_s0, %s601_s0 }
  0x30   :  { %p608_p8 = por %p607_p7, %p606_p6 }
  0x32   :  { %p609_p9 = pnand %p608_p8, %p602_p5 }
  0x34   :  { %612 = shalt.err (!%p609_p9)
}
  0x35   :  { %55 = dma.hbm_to_vmem [thread:$0]  %s932_s2, 512, %s50_s15, [#allocation9], %s713_s21, %s713_s21, %s714_s22  }
  0x36   :  { %s613_s30 = scalar_lea.hbm %s933_s3, 512 }
  0x37   :  { %p614_p10 = scmp.ne.s32.totalorder %s933_s3, %s613_s30  ;;  %p617_p11 = scmp.lt.u32.totalorder %s613_s30, %s933_s3 }
  0x39   :  { %p619_p12 = pnand %p617_p11, %p614_p10 }
  0x3b   :  { %622 = shalt.err (!%p619_p12)
}
  0x3c   :  { %s623_s14 = scalar_lea.vmem %s808_s17, 512  ;;  %p628_p0 = scmp.lt.s32.totalorder %s808_s17, %s808_s17 }
  0x3d   :  { %p624_p13 = scmp.ne.s32.totalorder %s808_s17, %s623_s14  ;;  %p629_p1 = scmp.lt.s32.totalorder %s623_s14, %s623_s14 }
  0x3f   :  { %p630_p2 = por %p629_p1, %p628_p0 }
  0x41   :  { %p631_p3 = pnand %p630_p2, %p624_p13 }
  0x43   :  { %634 = shalt.err (!%p631_p3)
}
  0x44   :  { %67 = dma.hbm_to_vmem [thread:$0]  %s933_s3, 512, %s808_s17, [#allocation12], %s713_s21, %s713_s21, %s714_s22  }
  0x45   :  { %701 = dma.done.wait [#allocation6], 256  }
  0x46   :  { %702 = vsyncadd [#allocation6], 4294967040 }
  0x47   :  { %703 = dma.done.wait [#allocation9], 1024  }
  0x48   :  { %704 = vsyncadd [#allocation9], 4294966272 }
  0x49   :  { %705 = dma.done.wait [#allocation12], 512  }
  0x4a   :  { %706 = vsyncadd [#allocation12], 4294966784  ;;  %vm90_vm0 = vcmask 261120   ;;  %v717_v0 = vmov 0.0   ;;  %v101_v1 = vld [vmem:[#allocation8] sm:$0xff]  ;;  %v102_v2 = vld [vmem:[#allocation8 + $0x8] sm:$0xff] }
  0x4b   :  { %92 = vst.msk [vmem:[#allocation2 + $0x8] sm:$0xff] %vm90_vm0, %v717_v0  ;;  %91 = vst.msk [vmem:[#allocation2] sm:$0xff] %vm90_vm0, %v717_v0  ;;  %v103_v3 = vld [vmem:[#allocation8 + $0x10] sm:$0xff]  ;;  %v513_v4 = vpack.c.bf16 %v102_v2, %v101_v1  ;;  %v104_v5 = vld [vmem:[#allocation8 + $0x18] sm:$0xff]  ;;  %s718_s19 = smov [#allocation13]   ;;  %s719_s23 = smov [#allocation14]  }
  0x4c   :  { %93 = vst.msk [vmem:[#allocation3] sm:$0xff] %vm90_vm0, %v717_v0  ;;  %94 = vst.msk [vmem:[#allocation3 + $0x8] sm:$0xff] %vm90_vm0, %v717_v0  ;;  %v193_v6 = vld [vmem:[#allocation10] sm:$0xff]  ;;  %v194_v7 = vld [vmem:[#allocation10 + $0x8] sm:$0xff]  ;;  %v517_v8 = vpack.c.bf16 %v104_v5, %v103_v3  ;;  %s408_s20 = sshll.u32 %s718_s19, 4  ;;  %s420_s24 = sshll.u32 %s719_s23, 4  ;;  %s409_s20 = int_to_ptr.vmem [resolvable:$true] %s408_s20  ;;  %s869_s24 = int_to_ptr.vmem [resolvable:$true] %s420_s24 }
  0x4d   :  { %95 = vst.msk [vmem:[#allocation4] sm:$0xff] %vm90_vm0, %v717_v0  ;;  %96 = vst.msk [vmem:[#allocation4 + $0x8] sm:$0xff] %vm90_vm0, %v717_v0  ;;  %v521_v9 = vpack.c.bf16 %v194_v7, %v193_v6  ;;  %v97_v10 = vld [vmem:[#allocation5] sm:$0xff]  ;;  %v278_v11 = vld [vmem:[#allocation11] sm:$0xff]  ;;  %514 = vmatprep.subr.bf16.mxu0 %v513_v4  ;;  %s635_s25 = scalar_lea.vmem %s409_s20, 256  ;;  %p640_p5 = scmp.lt.s32.totalorder %s409_s20, %s409_s20 }
  0x4e   :  { %488 = vmatprep.mubr.msk.f32.mxu0 %vm90_vm0, %v97_v10  ;;  %v279_v12 = vld [vmem:[#allocation11 + $0x8] sm:$0xff]  ;;  %v195_v13 = vld [vmem:[#allocation10 + $0x10] sm:$0xff]  ;;  %v196_v14 = vld [vmem:[#allocation10 + $0x18] sm:$0xff]  ;;  %516 = vmatpush3.bf16.msra.mxu0 %v513_v4  ;;  %p636_p4 = scmp.ne.s32.totalorder %s409_s20, %s635_s25  ;;  %p641_p6 = scmp.lt.s32.totalorder %s635_s25, %s635_s25 }
  0x4f   :  { %522 = vmatprep.subr.bf16.mxu1 %v521_v9  ;;  %v525_v15 = vpack.c.bf16 %v196_v14, %v195_v13  ;;  %518 = vmatprep.subr.bf16.mxu0 %v517_v8  ;;  %v529_v16 = vpack.c.bf16 %v279_v12, %v278_v11  ;;  %v280_v17 = vld [vmem:[#allocation11 + $0x10] sm:$0xff]  ;;  %v281_v18 = vld [vmem:[#allocation11 + $0x18] sm:$0xff]  ;;  %v459_v36 = vld [vmem:[%s934_s4] ss:$0 sm:$0xff] }
  0x50   :  { %524 = vmatpush3.bf16.msra.mxu1 %v521_v9  ;;  %499 = vmatprep.mubr.msk.f32.mxu1 %vm90_vm0, %v97_v10  ;;  %v98_v19 = vld [vmem:[#allocation5 + $0x8] sm:$0xff]  ;;  %v533_v20 = vpack.c.bf16 %v281_v18, %v280_v17  ;;  %v460_v39 = vld [vmem:[%s935_s5] ss:$0 sm:$0xff]  ;;  %p642_p7 = por %p641_p6, %p640_p5 }
  0x51   :  { %526 = vmatprep.subr.bf16.mxu1 %v525_v15  ;;  %v461_v49 = vld [vmem:[%s936_s6] ss:$0 sm:$0xff] }
  0x52   :  { %520 = vmatpush3.bf16.msra.mxu0 %v517_v8  ;;  %v100_v21 = vld [vmem:[#allocation2 + $0x8] sm:$0xff]  ;;  %v99_v22 = vld [vmem:[#allocation2] sm:$0xff]  ;;  %p643_p8 = pnand %p642_p7, %p636_p4 }
  0x53   :  { %530 = vmatprep.subr.bf16.mxu0 %v529_v16  ;;  %v192_v23 = vld [vmem:[#allocation3 + $0x8] sm:$0xff]  ;;  %v191_v25 = vld [vmem:[#allocation3] sm:$0xff] }
  0x54   :  { %528 = vmatpush3.bf16.msra.mxu1 %v525_v15  ;;  %v277_v33 = vld [vmem:[#allocation4 + $0x8] sm:$0xff]  ;;  %v276_v34 = vld [vmem:[#allocation4] sm:$0xff] }
  0x55   :  { %489 = vmatmul.mubr.msk.f32.vlgmr.msra.gmra.mrb[0].mxu0 %vm90_vm0, %v98_v19 }
  0x56   :  { %532 = vmatpush3.bf16.msra.mxu0 %v529_v16  ;;  %510 = vmatprep.mubr.msk.f32.mxu0 %vm90_vm0, %v97_v10 }
  0x57   :  { %500 = vmatmul.mubr.msk.f32.vlgmr.msra.gmra.mrb[0].mxu1 %vm90_vm0, %v98_v19  ;;  %534 = vmatprep.subr.bf16.mxu0 %v533_v20 }
  0x5a   :  { %536 = vmatpush3.bf16.msra.mxu0 %v533_v20 }
  0x5d   :  { %511 = vmatmul.mubr.msk.f32.vlgmr.msra.gmra.mrb[2].mxu0 %vm90_vm0, %v98_v19 }
 0x128   :  { %v490_v24 = vpop.f32.mrb[0].mxu0 }
 0x129   :  { %v188_v26 = vadd.f32 %v490_v24, %v100_v21  ;;  %v178_v27 = vpop.f32.mrb[1].mxu0 }
 0x12a   :  { %v501_v28 = vpop.f32.mrb[0].mxu1  ;;  %v187_v29 = vadd.f32 %v178_v27, %v99_v22 }
 0x12b   :  { %v273_v30 = vadd.f32 %v501_v28, %v192_v23  ;;  %v263_v31 = vpop.f32.mrb[1].mxu1  ;;  %190 = vst.msk [vmem:[#allocation2 + $0x8] sm:$0xff] %vm90_vm0, %v188_v26 }
 0x12c   :  { %v272_v32 = vadd.f32 %v263_v31, %v191_v25  ;;  %189 = vst.msk [vmem:[#allocation2] sm:$0xff] %vm90_vm0, %v187_v29 }
 0x12d   :  { %275 = vst.msk [vmem:[#allocation3 + $0x8] sm:$0xff] %vm90_vm0, %v273_v30 }
 0x12e   :  { %274 = vst.msk [vmem:[#allocation3] sm:$0xff] %vm90_vm0, %v272_v32 }
 0x130   :  { %v512_v35 = vpop.f32.mrb[2].mxu0 }
 0x131   :  { %v358_v37 = vadd.f32 %v512_v35, %v277_v33  ;;  %v348_v38 = vpop.f32.mrb[3].mxu0 }
 0x132   :  { %v357_v40 = vadd.f32 %v348_v38, %v276_v34  ;;  %v365_v41 = vld [vmem:[#allocation2 + $0x8] sm:$0xff] }
 0x133   :  { %360 = vst.msk [vmem:[#allocation4 + $0x8] sm:$0xff] %vm90_vm0, %v358_v37  ;;  %v364_v43 = vld [vmem:[#allocation2] sm:$0xff]  ;;  %v374_v44 = vadd.f32 %v459_v36, %v365_v41 }
 0x134   :  { %v378_v42 = vld [vmem:[#allocation3 + $0x8] sm:$0xff]  ;;  %359 = vst.msk [vmem:[#allocation4] sm:$0xff] %vm90_vm0, %v357_v40  ;;  %v373_v47 = vadd.f32 %v459_v36, %v364_v43 }
 0x135   :  { %v377_v45 = vld [vmem:[#allocation3] sm:$0xff]  ;;  %v387_v46 = vadd.f32 %v460_v39, %v378_v42  ;;  %376 = vst.msk [vmem:[#allocation13 + $0x8] sm:$0xff] %vm90_vm0, %v374_v44 }
 0x136   :  { %v386_v48 = vadd.f32 %v460_v39, %v377_v45  ;;  %375 = vst.msk [vmem:[#allocation13] sm:$0xff] %vm90_vm0, %v373_v47 }
 0x137   :  { %389 = vst.msk [vmem:[#allocation14 + $0x8] sm:$0xff] %vm90_vm0, %v387_v46 }
 0x138   :  { %388 = vst.msk [vmem:[#allocation14] sm:$0xff] %vm90_vm0, %v386_v48 }
 0x139   :  { %646 = shalt.err (!%p643_p8)
}
 0x13a   :  { %s647_s12 = scalar_lea.hbm %s937_s7, 256 }
 0x13b   :  { %p648_p9 = scmp.ne.s32.totalorder %s937_s7, %s647_s12  ;;  %p651_p10 = scmp.lt.u32.totalorder %s647_s12, %s937_s7 }
 0x13d   :  { %p653_p11 = pnand %p651_p10, %p648_p9 }
 0x13f   :  { %656 = shalt.err (!%p653_p11)
}
 0x140   :  { %414 = dma.vmem_to_hbm [thread:$0]  %s409_s20, 256, %s937_s7, [#allocation7], %s713_s21, %s713_s21, %s714_s22  }
 0x141   :  { %s657_s13 = scalar_lea.vmem %s869_s24, 256  ;;  %p662_p13 = scmp.lt.s32.totalorder %s869_s24, %s869_s24 }
 0x142   :  { %p658_p12 = scmp.ne.s32.totalorder %s869_s24, %s657_s13  ;;  %p663_p0 = scmp.lt.s32.totalorder %s657_s13, %s657_s13 }
 0x144   :  { %p664_p1 = por %p663_p0, %p662_p13 }
 0x146   :  { %p665_p2 = pnand %p664_p1, %p658_p12 }
 0x148   :  { %668 = shalt.err (!%p665_p2)
}
 0x149   :  { %s669_s14 = scalar_lea.hbm %s938_s8, 256 }
 0x14a   :  { %p670_p3 = scmp.ne.s32.totalorder %s938_s8, %s669_s14  ;;  %p673_p4 = scmp.lt.u32.totalorder %s669_s14, %s938_s8 }
 0x14c   :  { %p675_p5 = pnand %p673_p4, %p670_p3 }
 0x14e   :  { %678 = shalt.err (!%p675_p5)
}
 0x14f   :  { %426 = dma.vmem_to_hbm [thread:$0]  %s869_s24, 256, %s938_s8, [#allocation15], %s713_s21, %s713_s21, %s714_s22   ;;  %v391_v50 = vld [vmem:[#allocation4 + $0x8] sm:$0xff]  ;;  %v390_v51 = vld [vmem:[#allocation4] sm:$0xff] }
 0x150   :  { %s720_s18 = smov [#allocation16]   ;;  %v400_v52 = vadd.f32 %v461_v49, %v391_v50  ;;  %v399_v53 = vadd.f32 %v461_v49, %v390_v51 }
 0x151   :  { %s432_s19 = sshll.u32 %s720_s18, 4  ;;  %s433_s19 = int_to_ptr.vmem [resolvable:$true] %s432_s19 }
 0x152   :  { %402 = vst.msk [vmem:[#allocation16 + $0x8] sm:$0xff] %vm90_vm0, %v400_v52  ;;  %401 = vst.msk [vmem:[#allocation16] sm:$0xff] %vm90_vm0, %v399_v53  ;;  %s679_s20 = scalar_lea.vmem %s433_s19, 256  ;;  %p684_p7 = scmp.lt.s32.totalorder %s433_s19, %s433_s19 }
 0x153   :  { %p680_p6 = scmp.ne.s32.totalorder %s433_s19, %s679_s20  ;;  %p685_p8 = scmp.lt.s32.totalorder %s679_s20, %s679_s20 }
 0x155   :  { %p686_p9 = por %p685_p8, %p684_p7 }
 0x157   :  { %p687_p10 = pnand %p686_p9, %p680_p6 }
 0x159   :  { %690 = shalt.err (!%p687_p10)
}
 0x15a   :  { %s691_s24 = scalar_lea.hbm %s939_s9, 256 }
 0x15b   :  { %p692_p11 = scmp.ne.s32.totalorder %s939_s9, %s691_s24  ;;  %p695_p12 = scmp.lt.u32.totalorder %s691_s24, %s939_s9 }
 0x15d   :  { %p697_p13 = pnand %p695_p12, %p692_p11 }
 0x15f   :  { %700 = shalt.err (!%p697_p13)
}
 0x160   :  { %438 = dma.vmem_to_hbm [thread:$0]  %s433_s19, 256, %s939_s9, [#allocation15], %s713_s21, %s713_s21, %s714_s22  }
 0x161   :  { %707 = dma.done.wait [#allocation7], 256  }
 0x162   :  { %708 = vsyncadd [#allocation7], 4294967040 }
 0x163   :  { %709 = dma.done.wait [#allocation15], 512  }
 0x164   :  { %710 = vsyncadd [#allocation15], 4294966784 }
 0x165   :  { %448 = vsyncpa [#allocation6], 1 }
 0x166   :  { %449 = vsyncpa [#allocation9], 1 }
 0x167   :  { %450 = vsyncpa [#allocation12], 1 }
 0x168   :  { %451 = vsyncpa [#allocation7], 1 }
 0x169   :  { %452 = vsyncpa [#allocation15], 1 }

</bundles_post_ra>
